<compile_context>
chip_gen: v6e
topology: v6e:2x2x1
jax: 0.10.0
libtpu: 0.0.40
codegen_flags: <defaults>
</compile_context>

<pallas_src>
import functools
import math

import jax
import jax.numpy as jnp
from jax.experimental import pallas as pl
from jax.experimental.pallas import tpu as pltpu

_TILE_BYTES_TARGET = 4 * 1024 * 1024      # ~4 MiB of x per grid step


def _pos_enc_kernel(x_ref, pe_ref, o_ref):
    # x_ref: (ts, B, E), pe_ref: (ts, 1, E) -> sublane broadcast over the batch axis.
    o_ref[...] = (x_ref[...] + pe_ref[...]).astype(o_ref.dtype)


def _pos_enc_dropout_kernel(x_ref, pe_ref, u_ref, o_ref, *, dropout_rate):
    # Inverted dropout fused with the add: zero with prob p, scale survivors.
    y = x_ref[...] + pe_ref[...]
    keep = u_ref[...] >= jnp.float32(dropout_rate)        # P(keep) = 1 - p
    scale = jnp.asarray(1.0 / (1.0 - dropout_rate), dtype=y.dtype)
    o_ref[...] = jnp.where(keep, y * scale, jnp.zeros_like(y)).astype(o_ref.dtype)


def make_positional_encoding(d_model, max_len=5000):
    """Fixed sin/cos buffer, shaped (max_len, 1, d_model) like the torch buffer."""
    position = jnp.arange(max_len, dtype=jnp.float32)[:, None]
    div_term = jnp.exp(
        jnp.arange(0, d_model, 2, dtype=jnp.float32) * (-math.log(10000.0) / d_model)
    )
    angles = position * div_term[None, :]                 # (max_len, d_model // 2)
    pe = jnp.zeros((max_len, d_model), dtype=jnp.float32)
    pe = pe.at[:, 0::2].set(jnp.sin(angles))
    pe = pe.at[:, 1::2].set(jnp.cos(angles))
    return pe[:, None, :]                                 # (max_len, 1, d_model)


def _pick_tile(S, B, E, itemsize, block_s):
    if block_s is not None:
        return max(1, min(S, int(block_s)))
    bytes_per_row = max(1, B * E * itemsize)
    ts = max(1, min(S, _TILE_BYTES_TARGET // bytes_per_row))
    # Keep >= 2 grid steps when the whole problem would fit a single tile so that
    # dimension_semantics=("parallel",) can shard across both TensorCores on v7x.
    # On single-TC v5e/v6e the extra pipeline step costs only ~0.35 us.
    if ts >= S and S >= 16:
        ts = -(-S // 2)
    return ts


@functools.partial(jax.jit, static_argnames=("dropout_rate", "block_s"))
def positional_encoding_forward(x, pe, rng=None, *, dropout_rate=0.0, block_s=None):
    """dropout(x + pe[:S]).  x: (S, B, E), pe: (max_len, 1, E), rng: key (training)."""
    S, B, E = x.shape
    pe_s = pe[:S].astype(x.dtype)                         # (S, 1, E), static slice
    ts = _pick_tile(S, B, E, jnp.dtype(x.dtype).itemsize, block_s)
    grid = (pl.cdiv(S, ts),)                              # partial last block OK (leading axis)

    x_spec = pl.BlockSpec((ts, B, E), lambda i: (i, 0, 0))
    pe_spec = pl.BlockSpec((ts, 1, E), lambda i: (i, 0, 0))
    out_spec = pl.BlockSpec((ts, B, E), lambda i: (i, 0, 0))
    out_shape = jax.ShapeDtypeStruct((S, B, E), x.dtype)
    compiler_params = pltpu.CompilerParams(
        dimension_semantics=("parallel",),
        vmem_limit_bytes=48 * 1024 * 1024,
    )

    if float(dropout_rate) > 0.0:
        if rng is None:
            raise ValueError("dropout_rate > 0 requires an rng key")
        u = jax.random.uniform(rng, x.shape, dtype=jnp.float32)
        u_spec = pl.BlockSpec((ts, B, E), lambda i: (i, 0, 0))
        kernel = functools.partial(
            _pos_enc_dropout_kernel, dropout_rate=float(dropout_rate)
        )
        return pl.pallas_call(
            kernel,
            out_shape=out_shape,
            grid=grid,
            in_specs=[x_spec, pe_spec, u_spec],
            out_specs=out_spec,
            compiler_params=compiler_params,
        )(x, pe_s, u)

    return pl.pallas_call(
        _pos_enc_kernel,
        out_shape=out_shape,
        grid=grid,
        in_specs=[x_spec, pe_spec],
        out_specs=out_spec,
        compiler_params=compiler_params,
    )(x, pe_s)


if __name__ == "__main__":
    # Module config: d_model (embed dim), small sequence / batch.
    d_model = 128
    max_len = 512
    S, B = 64, 8

    key = jax.random.PRNGKey(0)
    kx, kd = jax.random.split(key)
    x = jax.random.normal(kx, (S, B, d_model), dtype=jnp.float32)
    pe = make_positional_encoding(d_model, max_len=max_len)
    ref = x + pe[:S]

    # --- eval / inference path (dropout == identity), exact check ---
    out = jax.block_until_ready(positional_encoding_forward(x, pe, dropout_rate=0.0))
    assert out.shape == (S, B, d_model), out.shape
    assert jnp.allclose(out, ref, atol=1e-6, rtol=1e-6), float(
        jnp.max(jnp.abs(out - ref))
    )

    # --- training path: fused dropout with p = 0.1 (stochastic mask) ---
    p = 0.1
    out_tr = jax.block_until_ready(
        positional_encoding_forward(x, pe, kd, dropout_rate=p)
    )
    kept = out_tr != 0.0
    scaled = ref / (1.0 - p)
    # surviving elements must equal (x + pe) / (1 - p)
    assert jnp.allclose(jnp.where(kept, out_tr, scaled), scaled, atol=1e-5, rtol=1e-5)
    drop_frac = 1.0 - float(jnp.mean(kept.astype(jnp.float32)))
    assert 0.05 < drop_frac < 0.15, drop_frac

    print("KERNEL_OK")
</pallas_src>

<mosaic_0001>
module attributes {stable_mosaic.version = 11 : i64} {
  func.func @_pos_enc_kernel(%arg0: i32, %arg1: memref<32x8x128xf32, #tpu.memory_space<vmem>>, %arg2: memref<32x1x128xf32, #tpu.memory_space<vmem>>, %arg3: memref<32x8x128xf32, #tpu.memory_space<vmem>>) attributes {dimension_semantics = [#tpu.dimension_semantics<parallel>], iteration_bounds = array<i64: 2>, scalar_prefetch = 0 : i64, scratch_operands = 0 : i64, tpu.core_type = #tpu.core_type<tc>, window_params = [{transform_indices = @transform_0, window_bounds = array<i64: 32, 8, 128>}, {transform_indices = @transform_1, window_bounds = array<i64: 32, 1, 128>}, {transform_indices = @transform_2, window_bounds = array<i64: 32, 8, 128>}]} {
    %c0 = arith.constant 0 : index
    %c0_0 = arith.constant 0 : index
    %c0_1 = arith.constant 0 : index
    %0 = vector.load %arg1[%c0, %c0_0, %c0_1] : memref<32x8x128xf32, #tpu.memory_space<vmem>>, vector<32x8x128xf32>
    %c0_2 = arith.constant 0 : index
    %c0_3 = arith.constant 0 : index
    %c0_4 = arith.constant 0 : index
    %1 = vector.load %arg2[%c0_2, %c0_3, %c0_4] : memref<32x1x128xf32, #tpu.memory_space<vmem>>, vector<32x1x128xf32>
    %2 = vector.broadcast %1 : vector<32x1x128xf32> to vector<32x8x128xf32>
    %3 = arith.addf %0, %2 : vector<32x8x128xf32>
    %c0_5 = arith.constant 0 : index
    %c0_6 = arith.constant 0 : index
    %c0_7 = arith.constant 0 : index
    %4 = vector.load %arg3[%c0_5, %c0_6, %c0_7] : memref<32x8x128xf32, #tpu.memory_space<vmem>>, vector<32x8x128xf32>
    tpu.vector_store %arg3[%c0_5, %c0_6, %c0_7], %3 {strides = array<i32>} : memref<32x8x128xf32, #tpu.memory_space<vmem>>, vector<32x8x128xf32>,
    return
  }
  func.func @transform_0(%arg0: i32) -> (i32, i32, i32) {
    %c0_i32 = arith.constant 0 : i32
    %c0_i32_0 = arith.constant 0 : i32
    %c0_i32_1 = arith.constant 0 : i32
    return %arg0, %c0_i32, %c0_i32_0 : i32, i32, i32
  }
  func.func @transform_1(%arg0: i32) -> (i32, i32, i32) {
    %c0_i32 = arith.constant 0 : i32
    %c0_i32_0 = arith.constant 0 : i32
    %c0_i32_1 = arith.constant 0 : i32
    return %arg0, %c0_i32, %c0_i32_0 : i32, i32, i32
  }
  func.func @transform_2(%arg0: i32) -> (i32, i32, i32) {
    %c0_i32 = arith.constant 0 : i32
    %c0_i32_0 = arith.constant 0 : i32
    %c0_i32_1 = arith.constant 0 : i32
    return %arg0, %c0_i32, %c0_i32_0 : i32, i32, i32
  }
}

</mosaic_0001>

<bundles_post_ra>
// kernel: positional_encoding_forward.1
= control target key start
LH: loop header
LB: loop body
LE: loop exit
PB: predicated region body
PF: predicated region fallthrough
CT: control target
= control target key end

     0   :  { %7 = vsyncpa [#allocation3], 0  ;;  %s1074_s0 = inlined_call_operand.hbm [shape: f32[64,8,128], index: 0, kind: input, shape index: {}]   ;;  %s1075_s1 = inlined_call_operand.vmem [shape: f32[64,1,128], index: 1, kind: input, shape index: {}]   ;;  %s1076_s2 = inlined_call_operand.hbm [shape: f32[64,8,128], index: 2, kind: output, shape index: {}]  }
   0x1   :  { %9 = vsyncpa [#allocation3 + $0x1], 0 }
   0x2   :  { %10 = vsyncpa [#allocation4], 0 }
   0x3   :  { %12 = vsyncpa [#allocation4 + $0x1], 0  ;;  %s813_s9 = smov 0   ;;  %s815_s10 = smov 0  }
   0x4   :  { %s817_s11 = smov 0   ;;  %s819_s12 = smov 0  }
   0x5 LB: > { %s834_s13 = sadd.s32 4294967295, %s790_s12   ;;  %s599_s14 = sadd.s32 4294967294, %s790_s12   ;;  %s790_s12 = sphi %s819_s12, %s1091_s12   ;;  %s786_s11 = sphi %s817_s11, %s1090_s11   ;;  %s782_s10 = sphi %s815_s10, %s1089_s10   ;;  %s778_s9 = sphi %s813_s9, %s1088_s9  }
   0x6   : > { %s838_s15 = sadd.s32 1, %s790_s12   ;;  %s25_s16 = sadd.s32 1, %s786_s11 }
   0x7   : > { %s22_s17 = ssub.s32 %s790_s12, %s838_s15  ;;  %p32_p0 = scmp.ne.s32.totalorder %s786_s11, %s782_s10 }
   0x8   : > { %p23_p1 = scmp.eq.s32.totalorder %s22_s17, 0  ;;  %p33_p2 = scmp.eq.s32.totalorder %s790_s12, 0 }
   0x9   : > { %p38_p3 = scmp.ne.s32.totalorder %s782_s10, %s778_s9  ;;  %p39_p4 = scmp.eq.s32.totalorder %s834_s13, 0 }
   0xa   : > { %s850_s18 = scalar_select %p23_p1, %s786_s11, %s25_s16  }
   0xb   : > { %p852_p5 = por %p33_p2, %p32_p0  ;;  %p856_p6 = por %p39_p4, %p38_p3 }
   0xc   : > { %p88_p7 = scmp.eq.s32.totalorder %s834_s13, 1  ;;  %p94_p8 = scmp.eq.s32.totalorder %s599_s14, 1 }
   0xd   : > { %s1080_s20 = scalar_select %p856_p6, 1, 0 }
   0xe   : > { %p660_p10 = scmp.lt.s32.totalorder %s790_s12, 2  ;;  %p863_p11 = por %p88_p7, %p32_p0 }
   0xf   : > { %p867_p12 = por %p94_p8, %p38_p3  ;;  %s114_s23 = sand.u32 1, %s786_s11  }
  0x10   : > { %s1081_s21 = scalar_select %p863_p11, 1, 0 }
  0x11   : > { %s1082_s22 = scalar_select %p867_p12, 1, 0 }
  0x12   : > { %s646_s24 = sshll.u32 %s790_s12, 12  ;;  %s602_s25 = sshll.u32 %s114_s23, 8 }
  0x13   : > { %s876_s28 = scalar_lea.hbm %s1074_s0, %s646_s24  ;;  %s118_s29 = scalar_lea.vmem [#allocation2], %s602_s25 }
  0x14   : > { %s125_s30 = sshll.u32 %s118_s29, 4  ;;  %p880_p13 = pnand %p660_p10, %p852_p5  ;;  %s884_s30 = int_to_ptr.vmem [resolvable:$true] %s125_s30 }
  0x15   : > { %s886_s4 = scalar_lea.sflag [#allocation3], %s114_s23  ;;  %s698_s5 = scalar_lea.hbm %s876_s28, 4096 }
  0x16   : > { %p699_p0 = scmp.ne.s32.totalorder %s876_s28, %s698_s5  ;;  %p700_p1 = pneg %p880_p13 }
  0x17   : > { %s703_s8 = scalar_lea.hbm %s1074_s0, 8192  ;;  %p704_p4 = scmp.lt.s32.totalorder %s876_s28, %s1074_s0 }
  0x18   : > { %p701_p2 = pnand %p700_p1, %p699_p0  ;;  %p705_p5 = scmp.lt.s32.totalorder %s703_s8, %s698_s5 }
  0x1a   : > { %p702_p3 = pneg %p701_p2  ;;  %p706_p7 = por %p705_p5, %p704_p4 }
  0x1c   : > { %p707_p8 = pnand %p706_p7, %p702_p3 }
  0x1e   : > { %710 = shalt.err (!%p707_p8)
}
  0x1f   : > { %s711_s17 = scalar_lea.vmem %s884_s30, 4096  ;;  %s792_s19 = smov [#allocation2]  }
  0x20   : > { %p712_p10 = scmp.ne.s32.totalorder %s884_s30, %s711_s17  ;;  %s716_s23 = sshll.u32 %s792_s19, 4  ;;  %s717_s23 = int_to_ptr.vmem [resolvable:$false] %s716_s23 }
  0x21   : > { %s718_s24 = scalar_lea.vmem %s717_s23, 8192  ;;  %p719_p2 = scmp.lt.s32.totalorder %s884_s30, %s717_s23 }
  0x22   : > { %p714_p9 = pnand %p712_p10, %p700_p1  ;;  %p720_p12 = scmp.lt.s32.totalorder %s718_s24, %s711_s17 }
  0x24   : > { %p715_p0 = pneg %p714_p9  ;;  %p721_p11 = por %p720_p12, %p719_p2 }
  0x26   : > { %p722_p6 = pnand %p721_p11, %p715_p0 }
  0x28   : > { %725 = shalt.err (!%p722_p6)
}
  0x29   : > { %s793_s25 = smov 128   ;;  %s794_s26 = smov 8  }
  0x2a   : > { %655 = dma.hbm_to_vmem [thread:$0]  (!%p880_p13), %s876_s28, 4096, %s884_s30, %s886_s4, %s793_s25, %s793_s25, %s794_s26  }
  0x2b   : > { %p605_p9 = scmp.ge.s32.totalorder %s790_s12, 1  ;;  %p141_p1 = scmp.lt.s32.totalorder %s790_s12, 3 }
  0x2d   : > { %p142_p3 = pnand %p605_p9, %p141_p1 }
  0x2e   : > { %s910_s27 = sand.u32 (!%p142_p3), 1, %s782_s10   ;;  %p1084_p6 = scmp.ne.s32.totalorder (!%p142_p3), %s1080_s20, 0 }
  0x2f   : > { %145 = sbr.rel (%p142_p3) target bundleno = 95 (0x5f), region = 28  ;;  %s606_s29 = sshll.u32 (!%p142_p3), %s910_s27, 8 }
  0x30   : > { %s148_s5 = scalar_lea.sflag (!%p142_p3), [#allocation3], %s910_s27  ;;  %s914_s6 = scalar_lea.vmem (!%p142_p3), [#allocation2], %s606_s29 }
  0x34   : > { %769 = dma.done.wait (%p1084_p6), %s148_s5, 4096  }
  0x35   : > { %771 = vsyncadd (%p1084_p6), %s148_s5, 4294963200  ;;  %s608_s28 = sshll.u32 %s834_s13, 5  ;;  %v183_v0 = vld [vmem:[%s914_s6] sm:$0xff]  ;;  %v184_v2 = vld [vmem:[%s914_s6 + $0x8] sm:$0xff]  ;;  %s935_s20 = scalar_lea.vmem [#allocation5], %s606_s29 }
  0x36   : > { %p178_p11 = scmp.lt.s32.totalorder %s608_s28, 63  ;;  %v185_v5 = vld [vmem:[%s914_s6 + $0x10] sm:$0xff]  ;;  %v186_v9 = vld [vmem:[%s914_s6 + $0x18] sm:$0xff]  ;;  %v187_v11 = vld [vmem:[%s914_s6 + $0x20] sm:$0xff]  ;;  %s647_s7 = sshll.u32 %s834_s13, 12 }
  0x37   : > { %v188_v14 = vld [vmem:[%s914_s6 + $0x28] sm:$0xff]  ;;  %v189_v18 = vld [vmem:[%s914_s6 + $0x30] sm:$0xff]  ;;  %v190_v20 = vld [vmem:[%s914_s6 + $0x38] sm:$0xff]  ;;  %s517_s8 = sshll.u32 %s935_s20, 4  ;;  %s1025_s16 = scalar_lea.hbm %s1076_s2, %s647_s7  ;;  %s1027_s8 = int_to_ptr.vmem [resolvable:$true] %s517_s8 }
  0x38   : > { %s1093_s28 = smov (!%p178_p11, %s608_s28), 63  ;;  %v191_v23 = vld [vmem:[%s914_s6 + $0x40] sm:$0xff]  ;;  %v192_v27 = vld [vmem:[%s914_s6 + $0x48] sm:$0xff]  ;;  %v193_v29 = vld [vmem:[%s914_s6 + $0x50] sm:$0xff]  ;;  %s504_s17 = scalar_lea.sflag [#allocation4], %s910_s27 }
  0x39   : > { %s924_s4 = scalar_lea.vmem %s1075_s1, %s1093_s28  ;;  %v194_v32 = vld [vmem:[%s914_s6 + $0x58] sm:$0xff]  ;;  %v195_v36 = vld [vmem:[%s914_s6 + $0x60] sm:$0xff]  ;;  %v196_v38 = vld [vmem:[%s914_s6 + $0x68] sm:$0xff]  ;;  %s726_s19 = scalar_lea.vmem %s1027_s8, 4096 }
  0x3a   : > { %v609_v1 = vld [vmem:[%s924_s4] ss:$0 sm:$0xff]  ;;  %v610_v4 = vld [vmem:[%s924_s4 + $0x1] ss:$0 sm:$0xff]  ;;  %v611_v6 = vld [vmem:[%s924_s4 + $0x2] ss:$0 sm:$0xff]  ;;  %p727_p12 = scmp.ne.s32.totalorder %s1027_s8, %s726_s19 }
  0x3b   : > { %v439_v3 = vadd.f32 %v609_v1, %v183_v0  ;;  %v440_v7 = vadd.f32 %v610_v4, %v184_v2  ;;  %v441_v8 = vadd.f32 %v611_v6, %v185_v5  ;;  %v612_v10 = vld [vmem:[%s924_s4 + $0x3] ss:$0 sm:$0xff]  ;;  %v613_v13 = vld [vmem:[%s924_s4 + $0x4] ss:$0 sm:$0xff]  ;;  %v614_v15 = vld [vmem:[%s924_s4 + $0x5] ss:$0 sm:$0xff] }
  0x3c   : > { %v442_v12 = vadd.f32 %v612_v10, %v186_v9  ;;  %v443_v16 = vadd.f32 %v613_v13, %v187_v11  ;;  %v444_v17 = vadd.f32 %v614_v15, %v188_v14  ;;  %v615_v19 = vld [vmem:[%s924_s4 + $0x6] ss:$0 sm:$0xff]  ;;  %v616_v22 = vld [vmem:[%s924_s4 + $0x7] ss:$0 sm:$0xff]  ;;  %v617_v24 = vld [vmem:[%s924_s4 + $0x8] ss:$0 sm:$0xff] }
  0x3d   : > { %471 = vst [vmem:[%s935_s20] sm:$0xff] %v439_v3  ;;  %472 = vst [vmem:[%s935_s20 + $0x8] sm:$0xff] %v440_v7  ;;  %v445_v21 = vadd.f32 %v615_v19, %v189_v18  ;;  %v446_v25 = vadd.f32 %v616_v22, %v190_v20  ;;  %v447_v26 = vadd.f32 %v617_v24, %v191_v23  ;;  %v618_v28 = vld [vmem:[%s924_s4 + $0x9] ss:$0 sm:$0xff]  ;;  %v619_v31 = vld [vmem:[%s924_s4 + $0xa] ss:$0 sm:$0xff]  ;;  %p1085_p13 = scmp.ne.s32.totalorder %s1081_s21, 0 }
  0x3e   : > { %473 = vst [vmem:[%s935_s20 + $0x10] sm:$0xff] %v441_v8  ;;  %474 = vst [vmem:[%s935_s20 + $0x18] sm:$0xff] %v442_v12  ;;  %v448_v30 = vadd.f32 %v618_v28, %v192_v27  ;;  %v620_v33 = vld [vmem:[%s924_s4 + $0xb] ss:$0 sm:$0xff]  ;;  %v449_v34 = vadd.f32 %v619_v31, %v193_v29  ;;  %v621_v37 = vld [vmem:[%s924_s4 + $0xc] ss:$0 sm:$0xff] }
  0x3f   : > { %475 = vst [vmem:[%s935_s20 + $0x20] sm:$0xff] %v443_v16  ;;  %476 = vst [vmem:[%s935_s20 + $0x28] sm:$0xff] %v444_v17  ;;  %v450_v35 = vadd.f32 %v620_v33, %v194_v32  ;;  %v451_v39 = vadd.f32 %v621_v37, %v195_v36  ;;  %v622_v40 = vld [vmem:[%s924_s4 + $0xd] ss:$0 sm:$0xff]  ;;  %v197_v41 = vld [vmem:[%s914_s6 + $0x70] sm:$0xff]  ;;  %p728_p4 = pnand %p727_p12, %p1085_p13  ;;  %s795_s23 = smov [#allocation5]  }
  0x40   : > { %477 = vst [vmem:[%s935_s20 + $0x30] sm:$0xff] %v445_v21  ;;  %478 = vst [vmem:[%s935_s20 + $0x38] sm:$0xff] %v446_v25  ;;  %v623_v42 = vld [vmem:[%s924_s4 + $0xe] ss:$0 sm:$0xff]  ;;  %v452_v43 = vadd.f32 %v622_v40, %v196_v38  ;;  %v198_v45 = vld [vmem:[%s914_s6 + $0x78] sm:$0xff]  ;;  %s730_s24 = sshll.u32 %s795_s23, 4  ;;  %s731_s24 = int_to_ptr.vmem [resolvable:$false] %s730_s24 }
  0x41   : > { %479 = vst [vmem:[%s935_s20 + $0x40] sm:$0xff] %v447_v26  ;;  %480 = vst [vmem:[%s935_s20 + $0x48] sm:$0xff] %v448_v30  ;;  %v453_v44 = vadd.f32 %v623_v42, %v197_v41  ;;  %v624_v46 = vld [vmem:[%s924_s4 + $0xf] ss:$0 sm:$0xff]  ;;  %v199_v47 = vld [vmem:[%s914_s6 + $0x80] sm:$0xff]  ;;  %p729_p5 = pneg %p728_p4  ;;  %s732_s25 = scalar_lea.vmem %s731_s24, 8192 }
  0x42   : > { %481 = vst [vmem:[%s935_s20 + $0x50] sm:$0xff] %v449_v34  ;;  %482 = vst [vmem:[%s935_s20 + $0x58] sm:$0xff] %v450_v35  ;;  %v454_v48 = vadd.f32 %v624_v46, %v198_v45  ;;  %v625_v49 = vld [vmem:[%s924_s4 + $0x10] ss:$0 sm:$0xff]  ;;  %v200_v50 = vld [vmem:[%s914_s6 + $0x88] sm:$0xff]  ;;  %p733_p7 = scmp.lt.s32.totalorder %s1027_s8, %s731_s24  ;;  %p734_p8 = scmp.lt.s32.totalorder %s732_s25, %s726_s19 }
  0x43   : > { %483 = vst [vmem:[%s935_s20 + $0x60] sm:$0xff] %v451_v39  ;;  %v626_v51 = vld [vmem:[%s924_s4 + $0x11] ss:$0 sm:$0xff]  ;;  %484 = vst [vmem:[%s935_s20 + $0x68] sm:$0xff] %v452_v43  ;;  %v455_v52 = vadd.f32 %v625_v49, %v199_v47  ;;  %v627_v55 = vld [vmem:[%s924_s4 + $0x12] ss:$0 sm:$0xff] }
  0x44   : > { %485 = vst [vmem:[%s935_s20 + $0x70] sm:$0xff] %v453_v44  ;;  %v456_v53 = vadd.f32 %v626_v51, %v200_v50  ;;  %v201_v54 = vld [vmem:[%s914_s6 + $0x90] sm:$0xff]  ;;  %v202_v56 = vld [vmem:[%s914_s6 + $0x98] sm:$0xff]  ;;  %486 = vst [vmem:[%s935_s20 + $0x78] sm:$0xff] %v454_v48  ;;  %p735_p10 = por %p734_p8, %p733_p7 }
  0x45   : > { %v457_v57 = vadd.f32 %v627_v55, %v201_v54  ;;  %v628_v58 = vld [vmem:[%s924_s4 + $0x13] ss:$0 sm:$0xff]  ;;  %v203_v59 = vld [vmem:[%s914_s6 + $0xa0] sm:$0xff]  ;;  %v629_v60 = vld [vmem:[%s924_s4 + $0x14] ss:$0 sm:$0xff]  ;;  %487 = vst [vmem:[%s935_s20 + $0x80] sm:$0xff] %v455_v52 }
  0x46   : > { %488 = vst [vmem:[%s935_s20 + $0x88] sm:$0xff] %v456_v53  ;;  %v458_v61 = vadd.f32 %v628_v58, %v202_v56  ;;  %v459_v62 = vadd.f32 %v629_v60, %v203_v59  ;;  %v204_v63 = vld [vmem:[%s914_s6 + $0xa8] sm:$0xff]  ;;  %v630_v0 = vld [vmem:[%s924_s4 + $0x15] ss:$0 sm:$0xff]  ;;  %v631_v3 = vld [vmem:[%s924_s4 + $0x16] ss:$0 sm:$0xff]  ;;  %p736_p0 = pnand %p735_p10, %p729_p5 }
  0x47   : > { %v205_v1 = vld [vmem:[%s914_s6 + $0xb0] sm:$0xff]  ;;  %489 = vst [vmem:[%s935_s20 + $0x90] sm:$0xff] %v457_v57  ;;  %v460_v2 = vadd.f32 %v630_v0, %v204_v63  ;;  %v206_v4 = vld [vmem:[%s914_s6 + $0xb8] sm:$0xff]  ;;  %v207_v8 = vld [vmem:[%s914_s6 + $0xc0] sm:$0xff] }
  0x48   : > { %v632_v5 = vld [vmem:[%s924_s4 + $0x17] ss:$0 sm:$0xff]  ;;  %490 = vst [vmem:[%s935_s20 + $0x98] sm:$0xff] %v458_v61  ;;  %491 = vst [vmem:[%s935_s20 + $0xa0] sm:$0xff] %v459_v62  ;;  %v461_v6 = vadd.f32 %v631_v3, %v205_v1  ;;  %v633_v9 = vld [vmem:[%s924_s4 + $0x18] ss:$0 sm:$0xff] }
  0x49   : > { %v462_v7 = vadd.f32 %v632_v5, %v206_v4  ;;  %v208_v10 = vld [vmem:[%s914_s6 + $0xc8] sm:$0xff]  ;;  %492 = vst [vmem:[%s935_s20 + $0xa8] sm:$0xff] %v460_v2  ;;  %v463_v11 = vadd.f32 %v633_v9, %v207_v8  ;;  %v634_v12 = vld [vmem:[%s924_s4 + $0x19] ss:$0 sm:$0xff]  ;;  %v209_v13 = vld [vmem:[%s914_s6 + $0xd0] sm:$0xff] }
  0x4a   : > { %v635_v14 = vld [vmem:[%s924_s4 + $0x1a] ss:$0 sm:$0xff]  ;;  %493 = vst [vmem:[%s935_s20 + $0xb0] sm:$0xff] %v461_v6  ;;  %v464_v15 = vadd.f32 %v634_v12, %v208_v10  ;;  %v636_v18 = vld [vmem:[%s924_s4 + $0x1b] ss:$0 sm:$0xff]  ;;  %v211_v19 = vld [vmem:[%s914_s6 + $0xe0] sm:$0xff] }
  0x4b   : > { %494 = vst [vmem:[%s935_s20 + $0xb8] sm:$0xff] %v462_v7  ;;  %v465_v16 = vadd.f32 %v635_v14, %v209_v13  ;;  %v210_v17 = vld [vmem:[%s914_s6 + $0xd8] sm:$0xff]  ;;  %495 = vst [vmem:[%s935_s20 + $0xc0] sm:$0xff] %v463_v11  ;;  %v212_v22 = vld [vmem:[%s914_s6 + $0xe8] sm:$0xff] }
  0x4c   : > { %v466_v20 = vadd.f32 %v636_v18, %v210_v17  ;;  %v637_v21 = vld [vmem:[%s924_s4 + $0x1c] ss:$0 sm:$0xff]  ;;  %v638_v23 = vld [vmem:[%s924_s4 + $0x1d] ss:$0 sm:$0xff]  ;;  %496 = vst [vmem:[%s935_s20 + $0xc8] sm:$0xff] %v464_v15  ;;  %v213_v26 = vld [vmem:[%s914_s6 + $0xf0] sm:$0xff] }
  0x4d   : > { %497 = vst [vmem:[%s935_s20 + $0xd0] sm:$0xff] %v465_v16  ;;  %v467_v24 = vadd.f32 %v637_v21, %v211_v19  ;;  %v468_v25 = vadd.f32 %v638_v23, %v212_v22  ;;  %v639_v27 = vld [vmem:[%s924_s4 + $0x1e] ss:$0 sm:$0xff]  ;;  %v640_v30 = vld [vmem:[%s924_s4 + $0x1f] ss:$0 sm:$0xff] }
  0x4e   : > { %v214_v28 = vld [vmem:[%s914_s6 + $0xf8] sm:$0xff]  ;;  %498 = vst [vmem:[%s935_s20 + $0xd8] sm:$0xff] %v466_v20  ;;  %v469_v29 = vadd.f32 %v639_v27, %v213_v26 }
  0x4f   : > { %499 = vst [vmem:[%s935_s20 + $0xe0] sm:$0xff] %v467_v24  ;;  %500 = vst [vmem:[%s935_s20 + $0xe8] sm:$0xff] %v468_v25  ;;  %v470_v31 = vadd.f32 %v640_v30, %v214_v28 }
  0x50   : > { %501 = vst [vmem:[%s935_s20 + $0xf0] sm:$0xff] %v469_v29 }
  0x51   : > { %502 = vst [vmem:[%s935_s20 + $0xf8] sm:$0xff] %v470_v31 }
  0x52   : > { %739 = shalt.err (!%p736_p0)
}
  0x53   : > { %s740_s26 = scalar_lea.hbm %s1025_s16, 4096  ;;  %s744_s6 = scalar_lea.hbm %s1076_s2, 8192 }
  0x54   : > { %p741_p2 = scmp.ne.s32.totalorder %s1025_s16, %s740_s26  ;;  %p745_p3 = scmp.lt.s32.totalorder %s1025_s16, %s1076_s2 }
  0x55   : > { %p746_p6 = scmp.lt.s32.totalorder %s744_s6, %s740_s26 }
  0x56   : > { %p742_p9 = pnand %p741_p2, %p1085_p13 }
  0x57   : > { %p747_p11 = por %p746_p6, %p745_p3 }
  0x58   : > { %p743_p1 = pneg %p742_p9 }
  0x5a   : > { %p748_p12 = pnand %p747_p11, %p743_p1 }
  0x5c   : > { %751 = shalt.err (!%p748_p12)
}
  0x5d   : > { %s796_s3 = smov 128   ;;  %s797_s4 = smov 8  }
  0x5e   : > { %650 = dma.vmem_to_hbm [thread:$0]  (%p1085_p13), %s1027_s8, 4096, %s1025_s16, %s504_s17, %s796_s3, %s796_s3, %s797_s4  }
  0x5f PF: > { %s532_s20 = sand.u32 1, %s778_s9   ;;  %p1086_p4 = scmp.ne.s32.totalorder %s1082_s22, 0 }
  0x60   : > { %p1087_p5 = scmp.ge.s32.totalorder %s790_s12, 2  ;;  %s533_s7 = scalar_lea.sflag [#allocation4], %s532_s20 }
  0x62   : > { %p657_p7 = pnand %p1087_p5, %p1086_p4 }
  0x64   : > { %p658_p8 = pneg %p657_p7 }
  0x66   : > { %773 = dma.done.wait (%p658_p8), %s533_s7, 4096  }
  0x67   : > { %775 = vsyncadd (%p658_p8), %s533_s7, 4294963200  ;;  %p15_p10 = scmp.ge.s32.totalorder %s838_s15, 4   ;;  %s1088_s9 = smov %s782_s10 }
  0x68   : > { %s1089_s10 = smov %s786_s11  ;;  %s1090_s11 = smov %s850_s18 }
  0x69   : > { %s1091_s12 = smov %s838_s15  ;;  %17 = sbr.rel (!%p15_p10) target bundleno = 5 (0x5), region = 76 }
  0x6e   :  { %538 = vsyncpa [#allocation3], 1 }
  0x6f   :  { %540 = vsyncpa [#allocation3 + $0x1], 1 }
  0x70   :  { %541 = vsyncpa [#allocation4], 1 }
  0x71   :  { %543 = vsyncpa [#allocation4 + $0x1], 1 }

</bundles_post_ra>
